<compile_context>
chip_gen: v7x
topology: tpu7x:2x2x1
jax: 0.10.0
libtpu: 0.0.40
codegen_flags: <defaults>
</compile_context>

<pallas_src>
import jax
import jax.numpy as jnp
from jax.experimental import pallas as pl
from jax.experimental.pallas import tpu as pltpu


# --------------------------------------------------------------------------
# Kernels
# --------------------------------------------------------------------------
def _shared_linear_kernel(x_ref, w_ref, b_ref, o_ref):
    # x_ref: (tm, nf), w_ref: (nf, tw), b_ref: (1, tw), o_ref: (tm, tw)
    o_ref[...] = (
        jnp.dot(x_ref[...], w_ref[...], preferred_element_type=jnp.float32)
        + b_ref[...]
    ).astype(o_ref.dtype)


def _make_individual_kernel(n_vars, nf, tw):
    def kernel(x_ref, w_ref, b_ref, o_ref):
        # x_ref: (B, V*nf), w_ref: (V, nf, tw), b_ref: (V, 1, tw), o_ref: (B, V*tw)
        # Static unrolled loop over variables (V is small & known at trace time):
        # per-variable aligned 128-lane slice of x, MXU dot, bias add, and a
        # lane-slice store into the lane-dense (B, V*tw) output slab.
        for v in range(n_vars):
            xv = x_ref[:, v * nf:(v + 1) * nf]                      # (B, nf)
            yv = (
                jnp.dot(xv, w_ref[v], preferred_element_type=jnp.float32)
                + b_ref[v]
            )
            o_ref[:, v * tw:(v + 1) * tw] = yv.astype(o_ref.dtype)
    return kernel


# --------------------------------------------------------------------------
# Wrappers
# --------------------------------------------------------------------------
def _pick_block_m(M, block_m):
    """Largest multiple-of-8 divisor of M that is <= block_m (else full M)."""
    if M <= block_m:
        return M
    cand = (block_m // 8) * 8
    while cand >= 8:
        if M % cand == 0:
            return cand
        cand -= 8
    return M


def flatten_head_shared(x, w, b, *, block_m=512):
    """x: (B, V, D, P); w: (nf, tw); b: (tw,) -> (B, V, tw)."""
    B, V, D, P = x.shape
    nf = D * P
    tw = w.shape[1]
    M = B * V

    x2 = x.reshape(M, nf)          # free reshape (contiguous)
    b2 = b.reshape(1, tw)

    # Tile the row axis so DMA overlaps compute. block_m=512 keeps the
    # double-buffered working set (~2*(tm*nf + nf*tw + tm*tw)*4B) well under
    # the default scoped VMEM limit, including v7x's smaller 64 MiB VMEM.
    tm = _pick_block_m(M, block_m)
    grid_m = M // tm
    # TODO(synk): for very large nf, add a trailing K grid axis with a VMEM
    # f32 accumulator + pl.when init/finalize instead of one full-nf block.

    itemsize = jnp.dtype(x.dtype).itemsize
    cost = pl.CostEstimate(
        flops=2 * M * nf * tw,
        transcendentals=0,
        bytes_accessed=(M * nf + nf * tw + tw + M * tw) * itemsize,
    )

    out = pl.pallas_call(
        _shared_linear_kernel,
        out_shape=jax.ShapeDtypeStruct((M, tw), x.dtype),
        grid=(grid_m,),
        in_specs=[
            pl.BlockSpec((tm, nf), lambda i: (i, 0)),
            pl.BlockSpec((nf, tw), lambda i: (0, 0)),   # weight stays resident
            pl.BlockSpec((1, tw), lambda i: (0, 0)),
        ],
        out_specs=pl.BlockSpec((tm, tw), lambda i: (i, 0)),
        compiler_params=pltpu.CompilerParams(
            dimension_semantics=("parallel",)            # shard M across TCs (v7x)
        ),
        cost_estimate=cost,
    )(x2, w, b2)
    return out.reshape(B, V, tw)


def flatten_head_individual(x, w_all, b_all):
    """x: (B, V, D, P); w_all: (V, nf, tw); b_all: (V, tw) -> (B, V, tw)."""
    B, V, D, P = x.shape
    nf = D * P
    tw = w_all.shape[-1]

    # No HBM transposes: x stays in its natural row-major layout, flattened to
    # (B, V*nf) (free reshape); the output is produced as a lane-dense
    # (B, V*tw) slab and reshaped (free) to (B, V, tw).
    x2 = x.reshape(B, V * nf)
    b3 = b_all.reshape(V, 1, tw)

    itemsize = jnp.dtype(x.dtype).itemsize
    cost = pl.CostEstimate(
        flops=2 * B * V * nf * tw,
        transcendentals=0,
        bytes_accessed=(B * V * nf + V * nf * tw + V * tw + B * V * tw) * itemsize,
    )

    out = pl.pallas_call(
        _make_individual_kernel(V, nf, tw),
        out_shape=jax.ShapeDtypeStruct((B, V * tw), x.dtype),
        grid=(1,),
        in_specs=[
            pl.BlockSpec((B, V * nf), lambda i: (0, 0)),
            pl.BlockSpec((V, nf, tw), lambda i: (0, 0, 0)),
            pl.BlockSpec((V, 1, tw), lambda i: (0, 0, 0)),
        ],
        out_specs=pl.BlockSpec((B, V * tw), lambda i: (0, 0)),
        compiler_params=pltpu.CompilerParams(
            dimension_semantics=("arbitrary",)
        ),
        cost_estimate=cost,
    )(x2, w_all, b3)
    return out.reshape(B, V, tw)


# --------------------------------------------------------------------------
# Main
# --------------------------------------------------------------------------
if __name__ == "__main__":
    # Module hyperparameters (small, consistent with the forward pass).
    B = 2            # batch
    n_vars = 4       # number of variables
    d_model = 16     # model dim
    patch_num = 8    # patches
    nf = d_model * patch_num      # 128
    target_window = 32
    # head_dropout = 0 -> dropout is identity

    key = jax.random.PRNGKey(0)
    kx, kw_s, kb_s, kw_i, kb_i = jax.random.split(key, 5)

    # Input: (B, n_vars, d_model, patch_num)
    x = jax.random.normal(kx, (B, n_vars, d_model, patch_num), dtype=jnp.float32)

    # nn.Linear params (weight stored transposed as (nf, tw) for the matmul).
    bound = 1.0 / (nf ** 0.5)
    w_shared = jax.random.uniform(kw_s, (nf, target_window),
                                  minval=-bound, maxval=bound, dtype=jnp.float32)
    b_shared = jax.random.uniform(kb_s, (target_window,),
                                  minval=-bound, maxval=bound, dtype=jnp.float32)
    w_indiv = jax.random.uniform(kw_i, (n_vars, nf, target_window),
                                 minval=-bound, maxval=bound, dtype=jnp.float32)
    b_indiv = jax.random.uniform(kb_i, (n_vars, target_window),
                                 minval=-bound, maxval=bound, dtype=jnp.float32)

    # --- shared head (individual=False) ---
    out_shared = flatten_head_shared(x, w_shared, b_shared)
    out_shared = jax.block_until_ready(out_shared)
    ref_shared = x.reshape(B, n_vars, nf) @ w_shared + b_shared
    assert out_shared.shape == (B, n_vars, target_window)
    assert jnp.allclose(out_shared, ref_shared, atol=1e-5, rtol=1e-5)

    # --- individual head (individual=True) ---
    out_indiv = flatten_head_individual(x, w_indiv, b_indiv)
    out_indiv = jax.block_until_ready(out_indiv)
    ref_indiv = jnp.einsum(
        "bvn,vnt->bvt", x.reshape(B, n_vars, nf), w_indiv
    ) + b_indiv[None, :, :]
    assert out_indiv.shape == (B, n_vars, target_window)
    assert jnp.allclose(out_indiv, ref_indiv, atol=1e-5, rtol=1e-5)

    print("KERNEL_OK")
</pallas_src>

<mosaic_0001>
module attributes {stable_mosaic.version = 11 : i64} {
  func.func @_shared_linear_kernel(%arg0: i32, %arg1: memref<8x128xf32, #tpu.memory_space<vmem>>, %arg2: memref<128x32xf32, #tpu.memory_space<vmem>>, %arg3: memref<1x32xf32, #tpu.memory_space<vmem>>, %arg4: memref<8x32xf32, #tpu.memory_space<vmem>>) attributes {dimension_semantics = [#tpu.dimension_semantics<parallel>], iteration_bounds = array<i64: 1>, scalar_prefetch = 0 : i64, scratch_operands = 0 : i64, tpu.core_type = #tpu.core_type<tc>, window_params = [{transform_indices = @transform_0, window_bounds = array<i64: 8, 128>}, {pipeline_mode = #tpu.pipeline_mode<synchronous>, transform_indices = @transform_1, window_bounds = array<i64: 128, 32>}, {pipeline_mode = #tpu.pipeline_mode<synchronous>, transform_indices = @transform_2, window_bounds = array<i64: 1, 32>}, {transform_indices = @transform_3, window_bounds = array<i64: 8, 32>}]} {
    %c0 = arith.constant 0 : index
    %c0_0 = arith.constant 0 : index
    %0 = vector.load %arg1[%c0, %c0_0] : memref<8x128xf32, #tpu.memory_space<vmem>>, vector<8x128xf32>
    %c0_1 = arith.constant 0 : index
    %c0_2 = arith.constant 0 : index
    %1 = vector.load %arg2[%c0_1, %c0_2] : memref<128x32xf32, #tpu.memory_space<vmem>>, vector<128x32xf32>
    %cst = arith.constant dense<0.000000e+00> : vector<8x32xf32>
    %2 = tpu.matmul %0, %1, %cst {dimension_numbers = #tpu.dot_dimension_numbers<[1], [0], [0], [1], [0, 0, 1, 1], [], []>} : vector<8x128xf32>, vector<128x32xf32>, vector<8x32xf32> -> vector<8x32xf32>
    %c0_3 = arith.constant 0 : index
    %c0_4 = arith.constant 0 : index
    %3 = vector.load %arg3[%c0_3, %c0_4] : memref<1x32xf32, #tpu.memory_space<vmem>>, vector<1x32xf32>
    %4 = vector.broadcast %3 : vector<1x32xf32> to vector<8x32xf32>
    %5 = arith.addf %2, %4 : vector<8x32xf32>
    %c0_5 = arith.constant 0 : index
    %c0_6 = arith.constant 0 : index
    %6 = vector.load %arg4[%c0_5, %c0_6] : memref<8x32xf32, #tpu.memory_space<vmem>>, vector<8x32xf32>
    tpu.vector_store %arg4[%c0_5, %c0_6], %5 {strides = array<i32>} : memref<8x32xf32, #tpu.memory_space<vmem>>, vector<8x32xf32>,
    return
  }
  func.func @transform_0(%arg0: i32) -> (i32, i32) {
    %c0_i32 = arith.constant 0 : i32
    %c0_i32_0 = arith.constant 0 : i32
    return %arg0, %c0_i32 : i32, i32
  }
  func.func @transform_1(%arg0: i32) -> (i32, i32) {
    %c0_i32 = arith.constant 0 : i32
    %c0_i32_0 = arith.constant 0 : i32
    %c0_i32_1 = arith.constant 0 : i32
    return %c0_i32, %c0_i32_0 : i32, i32
  }
  func.func @transform_2(%arg0: i32) -> (i32, i32) {
    %c0_i32 = arith.constant 0 : i32
    %c0_i32_0 = arith.constant 0 : i32
    %c0_i32_1 = arith.constant 0 : i32
    return %c0_i32, %c0_i32_0 : i32, i32
  }
  func.func @transform_3(%arg0: i32) -> (i32, i32) {
    %c0_i32 = arith.constant 0 : i32
    %c0_i32_0 = arith.constant 0 : i32
    return %arg0, %c0_i32 : i32, i32
  }
}

</mosaic_0001>

<bundles_post_ra>
// kernel: tpu_custom_call.1
= control target key start
LH: loop header
LB: loop body
LE: loop exit
PB: predicated region body
PF: predicated region fallthrough
CT: control target
= control target key end

     0   :  { %v230_v3 = vmov 0.0|0.0   ;;  %vm231_vm0 = vmmov 0   ;;  %v232_v6 = vmov 0.0   ;;  %s320_s0 = inlined_call_operand.vmem [shape: f32[8,128], index: 0, kind: input, shape index: {}]   ;;  %s321_s1 = inlined_call_operand.vmem [shape: f32[128,32], index: 1, kind: input, shape index: {}]   ;;  %s322_s2 = inlined_call_operand.vmem [shape: f32[1,32], index: 2, kind: input, shape index: {}]   ;;  %s323_s3 = inlined_call_operand.hbm [shape: f32[8,32], index: 3, kind: output, shape index: {}]  }
   0x1   :  { %v16_v0 = vld [vmem:[%s321_s1] sm:$0xff]  ;;  %v17_v1 = vld [vmem:[%s321_s1 + $0x8] sm:$0xff]  ;;  %v18_v2 = vld [vmem:[%s321_s1 + $0x10] sm:$0xff]  ;;  %178 = vmatprep.subr.bf16.mxu0 %v230_v3  ;;  %175 = vmatprep.mubr.msk.f32.mxu0 %vm231_vm0, %v232_v6 }
   0x2   :  { %v179_v4 = vpack.c.bf16 %v17_v1, %v16_v0  ;;  %v19_v5 = vld [vmem:[%s321_s1 + $0x18] sm:$0xff]  ;;  %v20_v8 = vld [vmem:[%s321_s1 + $0x20] sm:$0xff]  ;;  %v21_v9 = vld [vmem:[%s321_s1 + $0x28] sm:$0xff] }
   0x3   :  { %v182_v7 = vpack.c.bf16 %v19_v5, %v18_v2 }
   0x4   :  { %180 = vmatpush3.bf16.msra.mxu0 %v179_v4 }
   0x5   :  { %181 = vmatprep.subr.bf16.mxu0 %v230_v3 }
   0x6   :  { %8 = vsyncpa [#allocation3], 0  ;;  %v185_v10 = vpack.c.bf16 %v21_v9, %v20_v8  ;;  %v22_v11 = vld [vmem:[%s321_s1 + $0x30] sm:$0xff]  ;;  %v23_v12 = vld [vmem:[%s321_s1 + $0x38] sm:$0xff]  ;;  %s233_s21 = smov [#allocation2]   ;;  %vm109_vm1 = vcmask 261120  }
   0x7   :  { %v188_v13 = vpack.c.bf16 %v23_v12, %v22_v11  ;;  %v24_v14 = vld [vmem:[%s321_s1 + $0x40] sm:$0xff]  ;;  %v25_v15 = vld [vmem:[%s321_s1 + $0x48] sm:$0xff]  ;;  %v26_v17 = vld [vmem:[%s321_s1 + $0x50] sm:$0xff]  ;;  %s117_s22 = sshll.u32 %s233_s21, 4  ;;  %s118_s22 = int_to_ptr.vmem [resolvable:$true] %s117_s22 }
   0x8   :  { %183 = vmatpush3.bf16.msra.mxu0 %v182_v7  ;;  %v191_v16 = vpack.c.bf16 %v25_v15, %v24_v14  ;;  %v27_v18 = vld [vmem:[%s321_s1 + $0x58] sm:$0xff]  ;;  %v28_v20 = vld [vmem:[%s321_s1 + $0x60] sm:$0xff]  ;;  %v29_v21 = vld [vmem:[%s321_s1 + $0x68] sm:$0xff]  ;;  %p211_p1 = scmp.lt.s32.totalorder %s118_s22, %s118_s22 }
   0x9   :  { %184 = vmatprep.subr.bf16.mxu0 %v230_v3  ;;  %v194_v19 = vpack.c.bf16 %v27_v18, %v26_v17  ;;  %v197_v22 = vpack.c.bf16 %v29_v21, %v28_v20  ;;  %v30_v23 = vld [vmem:[%s321_s1 + $0x70] sm:$0xff]  ;;  %v31_v24 = vld [vmem:[%s321_s1 + $0x78] sm:$0xff]  ;;  %v15_v26 = vld [vmem:[%s320_s0] sm:$0xff]  ;;  %s206_s1 = scalar_lea.vmem %s118_s22, 128 }
   0xa   :  { %v200_v25 = vpack.c.bf16 %v31_v24, %v30_v23  ;;  %v125_v27 = vld [vmem:[%s322_s2] ss:$0 sm:$0xff]  ;;  %p207_p0 = scmp.ne.s32.totalorder %s118_s22, %s206_s1  ;;  %p212_p2 = scmp.lt.s32.totalorder %s206_s1, %s206_s1 }
   0xc   :  { %186 = vmatpush3.bf16.msra.mxu0 %v185_v10  ;;  %p213_p3 = por %p212_p2, %p211_p1 }
   0xd   :  { %187 = vmatprep.subr.bf16.mxu0 %v230_v3 }
   0xe   :  { %p214_p4 = pnand %p213_p3, %p207_p0 }
  0x10   :  { %189 = vmatpush3.bf16.msra.mxu0 %v188_v13 }
  0x11   :  { %190 = vmatprep.subr.bf16.mxu0 %v230_v3 }
  0x14   :  { %192 = vmatpush3.bf16.msra.mxu0 %v191_v16 }
  0x15   :  { %193 = vmatprep.subr.bf16.mxu0 %v230_v3 }
  0x18   :  { %195 = vmatpush3.bf16.msra.mxu0 %v194_v19 }
  0x19   :  { %196 = vmatprep.subr.bf16.mxu0 %v230_v3 }
  0x1c   :  { %198 = vmatpush3.bf16.msra.mxu0 %v197_v22 }
  0x1d   :  { %199 = vmatprep.subr.bf16.mxu0 %v230_v3 }
  0x20   :  { %201 = vmatpush3.bf16.msra.mxu0 %v200_v25 }
  0x23   :  { %176 = vmatmul.mubr.f32.vlgmr.msra.gmra.mrb[0].mxu0 %v15_v26 }
  0xf6   :  { %v105_v28 = vpop.f32.mrb[0].mxu0 }
  0xf7   :  { %v106_v29 = vadd.f32 %v125_v27, %v105_v28  ;;  %v177_v30 = vpop.f32.mrb[1].mxu0 }
  0xf9   :  { %110 = vst.msk [vmem:[#allocation2] sm:$0xff] %vm109_vm1, %v106_v29 }
  0xfa   :  { %217 = shalt.err (!%p214_p4)
}
  0xfb   :  { %s218_s24 = scalar_lea.hbm %s323_s3, 128 }
  0xfc   :  { %p219_p5 = scmp.ne.s32.totalorder %s323_s3, %s218_s24  ;;  %p222_p6 = scmp.lt.u32.totalorder %s218_s24, %s323_s3 }
  0xfe   :  { %p224_p7 = pnand %p222_p6, %p219_p5 }
 0x100   :  { %227 = shalt.err (!%p224_p7)
}
 0x101   :  { %120 = dma.vmem_to_hbm [thread:$0]  %s118_s22, 128, %s323_s3, [#allocation3]  }
 0x102   :  { %228 = dma.done.wait [#allocation3], 128  }
 0x103   :  { %229 = vsyncadd [#allocation3], 4294967168 }
 0x104   :  { %124 = vsyncpa [#allocation3], 1 }

</bundles_post_ra>
